<compile_context>
chip_gen: v7x
topology: tpu7x:2x2x1
jax: 0.10.0
libtpu: 0.0.40
codegen_flags: <defaults>
</compile_context>

<pallas_src>
import functools
import math

import jax
import jax.numpy as jnp
from jax.experimental import pallas as pl
from jax.experimental.pallas import tpu as pltpu


def _mlp_kernel(xT_ref, w1_ref, b1_ref, w2_ref, b2_ref, w3_ref, b3_ref, oT_ref):
    # All three layers as [out, in] @ [in, TILE_B] MXU matmuls, lane-dense in B.
    xT = xT_ref[...]                                                  # [3,  TB] bf16
    h1 = jnp.dot(w1_ref[...], xT,
                 preferred_element_type=jnp.float32) + b1_ref[...]    # [32, TB] f32
    h1 = jnp.maximum(h1, 0.0).astype(jnp.bfloat16)
    h2 = jnp.dot(w2_ref[...], h1,
                 preferred_element_type=jnp.float32) + b2_ref[...]    # [64, TB] f32
    h2 = jnp.maximum(h2, 0.0).astype(jnp.bfloat16)
    oT_ref[...] = (jnp.dot(w3_ref[...], h2,
                           preferred_element_type=jnp.float32)
                   + b3_ref[...])                                     # [1,  TB] f32


def _round_up(n, m):
    return ((n + m - 1) // m) * m


@functools.partial(jax.jit, static_argnames=("tile_b",))
def mlp_forward(x, params, *, tile_b=1024):
    """x: [B, 3] float32.  params in PyTorch layout: w [out, in], b [out]."""
    w1, b1, w2, b2, w3, b3 = params
    B = x.shape[0]

    # Batch tile (multiple of 128 so the lane dim is dense), pad B up to it.
    tb = min(_round_up(tile_b, 128), _round_up(B, 128))
    Bp = _round_up(B, tb)
    xT = jnp.pad(x, ((0, Bp - B), (0, 0))).T.astype(jnp.bfloat16)     # [3, Bp]

    def col(b):  # bias as an [out, 1] f32 column (broadcast over lanes)
        return b.reshape(-1, 1).astype(jnp.float32)

    def resident(shape):  # full-array block, constant index -> stays in VMEM
        return pl.BlockSpec(shape, lambda i: (0, 0))

    grid = (Bp // tb,)
    oT = pl.pallas_call(
        _mlp_kernel,
        out_shape=jax.ShapeDtypeStruct((1, Bp), jnp.float32),
        grid=grid,
        in_specs=[
            pl.BlockSpec((3, tb), lambda i: (0, i)),   # streamed x tile
            resident((32, 3)), resident((32, 1)),      # fc1
            resident((64, 32)), resident((64, 1)),     # fc2
            resident((1, 64)), resident((1, 1)),       # fc3
        ],
        out_specs=pl.BlockSpec((1, tb), lambda i: (0, i)),
        compiler_params=pltpu.CompilerParams(
            dimension_semantics=("parallel",)),        # megacore on v7x
    )(
        xT,
        w1.astype(jnp.bfloat16), col(b1),
        w2.astype(jnp.bfloat16), col(b2),
        w3.astype(jnp.bfloat16), col(b3),
    )
    return oT[:, :B].T                                                # [B, 1]


def init_params(key):
    """PyTorch nn.Linear-style init (U[-1/sqrt(fan_in), +]), PyTorch layout."""
    dims = [(3, 32), (32, 64), (64, 1)]
    params = []
    for fan_in, fan_out in dims:
        key, kw, kb = jax.random.split(key, 3)
        bound = 1.0 / math.sqrt(fan_in)
        w = jax.random.uniform(kw, (fan_out, fan_in), jnp.float32, -bound, bound)
        b = jax.random.uniform(kb, (fan_out,), jnp.float32, -bound, bound)
        params += [w, b]
    return params


def reference_forward(x, params):
    w1, b1, w2, b2, w3, b3 = params
    h1 = jnp.maximum(x @ w1.T + b1, 0.0)
    h2 = jnp.maximum(h1 @ w2.T + b2, 0.0)
    return h2 @ w3.T + b3


if __name__ == "__main__":
    key = jax.random.PRNGKey(0)
    key, kx, kx2 = jax.random.split(key, 3)
    params = init_params(key)

    # Small check (single grid step, padded to one 128-lane tile).
    B = 8
    x = jax.random.normal(kx, (B, 3), jnp.float32)
    out = jax.block_until_ready(mlp_forward(x, params))
    ref = reference_forward(x, params)
    assert out.shape == (B, 1)
    assert jnp.allclose(out, ref, atol=5e-2, rtol=5e-2), "mismatch vs reference (B=8)"

    # Multi-step grid + padding path (B not a multiple of the tile).
    B2 = 300
    x2 = jax.random.normal(kx2, (B2, 3), jnp.float32)
    out2 = jax.block_until_ready(mlp_forward(x2, params, tile_b=128))
    ref2 = reference_forward(x2, params)
    assert out2.shape == (B2, 1)
    assert jnp.allclose(out2, ref2, atol=5e-2, rtol=5e-2), "mismatch vs reference (B=300)"

    print("KERNEL_OK")
</pallas_src>

<mosaic_0001>
module attributes {stable_mosaic.version = 11 : i64} {
  func.func @_mlp_kernel(%arg0: i32, %arg1: memref<3x128xbf16, #tpu.memory_space<vmem>>, %arg2: memref<32x3xbf16, #tpu.memory_space<vmem>>, %arg3: memref<32x1xf32, #tpu.memory_space<vmem>>, %arg4: memref<64x32xbf16, #tpu.memory_space<vmem>>, %arg5: memref<64x1xf32, #tpu.memory_space<vmem>>, %arg6: memref<1x64xbf16, #tpu.memory_space<vmem>>, %arg7: memref<1x1xf32, #tpu.memory_space<vmem>>, %arg8: memref<1x128xf32, #tpu.memory_space<vmem>>) attributes {dimension_semantics = [#tpu.dimension_semantics<parallel>], iteration_bounds = array<i64: 1>, scalar_prefetch = 0 : i64, scratch_operands = 0 : i64, tpu.core_type = #tpu.core_type<tc>, window_params = [{transform_indices = @transform_0, window_bounds = array<i64: 3, 128>}, {pipeline_mode = #tpu.pipeline_mode<synchronous>, transform_indices = @transform_1, window_bounds = array<i64: 32, 3>}, {pipeline_mode = #tpu.pipeline_mode<synchronous>, transform_indices = @transform_2, window_bounds = array<i64: 32, 1>}, {pipeline_mode = #tpu.pipeline_mode<synchronous>, transform_indices = @transform_3, window_bounds = array<i64: 64, 32>}, {pipeline_mode = #tpu.pipeline_mode<synchronous>, transform_indices = @transform_4, window_bounds = array<i64: 64, 1>}, {pipeline_mode = #tpu.pipeline_mode<synchronous>, transform_indices = @transform_5, window_bounds = array<i64: 1, 64>}, {pipeline_mode = #tpu.pipeline_mode<synchronous>, transform_indices = @transform_6, window_bounds = array<i64: 1, 1>}, {transform_indices = @transform_7, window_bounds = array<i64: 1, 128>}]} {
    %c0 = arith.constant 0 : index
    %c0_0 = arith.constant 0 : index
    %0 = vector.load %arg1[%c0, %c0_0] : memref<3x128xbf16, #tpu.memory_space<vmem>>, vector<3x128xbf16>
    %c0_1 = arith.constant 0 : index
    %c0_2 = arith.constant 0 : index
    %1 = vector.load %arg2[%c0_1, %c0_2] : memref<32x3xbf16, #tpu.memory_space<vmem>>, vector<32x3xbf16>
    %cst = arith.constant dense<0.000000e+00> : vector<32x128xf32>
    %2 = tpu.matmul %1, %0, %cst {dimension_numbers = #tpu.dot_dimension_numbers<[1], [0], [0], [1], [0, 0, 1, 1], [], []>} : vector<32x3xbf16>, vector<3x128xbf16>, vector<32x128xf32> -> vector<32x128xf32>
    %c0_3 = arith.constant 0 : index
    %c0_4 = arith.constant 0 : index
    %3 = vector.load %arg3[%c0_3, %c0_4] : memref<32x1xf32, #tpu.memory_space<vmem>>, vector<32x1xf32>
    %4 = vector.broadcast %3 : vector<32x1xf32> to vector<32x128xf32>
    %5 = arith.addf %2, %4 : vector<32x128xf32>
    %cst_5 = arith.constant 0.000000e+00 : f32
    %6 = vector.broadcast %cst_5 : f32 to vector<32x128xf32>
    %7 = arith.maximumf %5, %6 : vector<32x128xf32>
    %8 = arith.truncf %7 : vector<32x128xf32> to vector<32x128xbf16>
    %c0_6 = arith.constant 0 : index
    %c0_7 = arith.constant 0 : index
    %9 = vector.load %arg4[%c0_6, %c0_7] : memref<64x32xbf16, #tpu.memory_space<vmem>>, vector<64x32xbf16>
    %cst_8 = arith.constant dense<0.000000e+00> : vector<64x128xf32>
    %10 = tpu.matmul %9, %8, %cst_8 {dimension_numbers = #tpu.dot_dimension_numbers<[1], [0], [0], [1], [0, 0, 1, 1], [], []>} : vector<64x32xbf16>, vector<32x128xbf16>, vector<64x128xf32> -> vector<64x128xf32>
    %c0_9 = arith.constant 0 : index
    %c0_10 = arith.constant 0 : index
    %11 = vector.load %arg5[%c0_9, %c0_10] : memref<64x1xf32, #tpu.memory_space<vmem>>, vector<64x1xf32>
    %12 = vector.broadcast %11 : vector<64x1xf32> to vector<64x128xf32>
    %13 = arith.addf %10, %12 : vector<64x128xf32>
    %cst_11 = arith.constant 0.000000e+00 : f32
    %14 = vector.broadcast %cst_11 : f32 to vector<64x128xf32>
    %15 = arith.maximumf %13, %14 : vector<64x128xf32>
    %16 = arith.truncf %15 : vector<64x128xf32> to vector<64x128xbf16>
    %c0_12 = arith.constant 0 : index
    %c0_13 = arith.constant 0 : index
    %17 = vector.load %arg6[%c0_12, %c0_13] : memref<1x64xbf16, #tpu.memory_space<vmem>>, vector<1x64xbf16>
    %cst_14 = arith.constant dense<0.000000e+00> : vector<1x128xf32>
    %18 = tpu.matmul %17, %16, %cst_14 {dimension_numbers = #tpu.dot_dimension_numbers<[1], [0], [0], [1], [0, 0, 1, 1], [], []>} : vector<1x64xbf16>, vector<64x128xbf16>, vector<1x128xf32> -> vector<1x128xf32>
    %c0_15 = arith.constant 0 : index
    %c0_16 = arith.constant 0 : index
    %19 = vector.load %arg7[%c0_15, %c0_16] : memref<1x1xf32, #tpu.memory_space<vmem>>, vector<1x1xf32>
    %20 = vector.broadcast %19 : vector<1x1xf32> to vector<1x128xf32>
    %21 = arith.addf %18, %20 : vector<1x128xf32>
    %c0_17 = arith.constant 0 : index
    %c0_18 = arith.constant 0 : index
    %22 = vector.load %arg8[%c0_17, %c0_18] : memref<1x128xf32, #tpu.memory_space<vmem>>, vector<1x128xf32>
    tpu.vector_store %arg8[%c0_17, %c0_18], %21 {strides = array<i32>} : memref<1x128xf32, #tpu.memory_space<vmem>>, vector<1x128xf32>,
    return
  }
  func.func @transform_0(%arg0: i32) -> (i32, i32) {
    %c0_i32 = arith.constant 0 : i32
    %c0_i32_0 = arith.constant 0 : i32
    return %c0_i32, %arg0 : i32, i32
  }
  func.func @transform_1(%arg0: i32) -> (i32, i32) {
    %c0_i32 = arith.constant 0 : i32
    %c0_i32_0 = arith.constant 0 : i32
    %c0_i32_1 = arith.constant 0 : i32
    return %c0_i32, %c0_i32_0 : i32, i32
  }
  func.func @transform_2(%arg0: i32) -> (i32, i32) {
    %c0_i32 = arith.constant 0 : i32
    %c0_i32_0 = arith.constant 0 : i32
    %c0_i32_1 = arith.constant 0 : i32
    return %c0_i32, %c0_i32_0 : i32, i32
  }
  func.func @transform_3(%arg0: i32) -> (i32, i32) {
    %c0_i32 = arith.constant 0 : i32
    %c0_i32_0 = arith.constant 0 : i32
    %c0_i32_1 = arith.constant 0 : i32
    return %c0_i32, %c0_i32_0 : i32, i32
  }
  func.func @transform_4(%arg0: i32) -> (i32, i32) {
    %c0_i32 = arith.constant 0 : i32
    %c0_i32_0 = arith.constant 0 : i32
    %c0_i32_1 = arith.constant 0 : i32
    return %c0_i32, %c0_i32_0 : i32, i32
  }
  func.func @transform_5(%arg0: i32) -> (i32, i32) {
    %c0_i32 = arith.constant 0 : i32
    %c0_i32_0 = arith.constant 0 : i32
    %c0_i32_1 = arith.constant 0 : i32
    return %c0_i32, %c0_i32_0 : i32, i32
  }
  func.func @transform_6(%arg0: i32) -> (i32, i32) {
    %c0_i32 = arith.constant 0 : i32
    %c0_i32_0 = arith.constant 0 : i32
    %c0_i32_1 = arith.constant 0 : i32
    return %c0_i32, %c0_i32_0 : i32, i32
  }
  func.func @transform_7(%arg0: i32) -> (i32, i32) {
    %c0_i32 = arith.constant 0 : i32
    %c0_i32_0 = arith.constant 0 : i32
    return %c0_i32, %arg0 : i32, i32
  }
}

</mosaic_0001>

<bundles_post_ra>
// kernel: mlp_forward.1
= control target key start
LH: loop header
LB: loop body
LE: loop exit
PB: predicated region body
PF: predicated region fallthrough
CT: control target
= control target key end

     0   :  { %vm75_vm0 = vcmask 1040384   ;;  %vm76_vm1 = vcmask 1041408   ;;  %vm68_vm2 = vcmask 23552   ;;  %v432_v1 = vmov 65535   ;;  %s548_s0 = inlined_call_operand.vmem [shape: bf16[3,128], index: 0, kind: input, shape index: {}]   ;;  %s549_s1 = inlined_call_operand.vmem [shape: bf16[32,3], index: 1, kind: input, shape index: {}]   ;;  %s550_s2 = inlined_call_operand.vmem [shape: f32[32,1], index: 2, kind: input, shape index: {}]   ;;  %s551_s6 = inlined_call_operand.<no memory space> [shape: f32[1,1], index: 6, kind: input, shape index: {}]   ;;  %s552_s4 = inlined_call_operand.vmem [shape: f32[64,1], index: 4, kind: input, shape index: {}]   ;;  %s553_s3 = inlined_call_operand.vmem [shape: bf16[64,32], index: 3, kind: input, shape index: {}]   ;;  %s554_s5 = inlined_call_operand.vmem [shape: bf16[1,64], index: 5, kind: input, shape index: {}]   ;;  %s555_s7 = inlined_call_operand.vmem [shape: f32[1,128], index: 7, kind: output, shape index: {}]  }
   0x1   :  { %v29_v0 = vld [vmem:[%s548_s0] sm:$0x3]  ;;  %v77_v2 = vsel %vm75_vm0, 4294967295, %v432_v1  ;;  %v12_v4 = vstv %s551_s6  ;;  %v433_v8 = vmov 0   ;;  %v36_v9 = vld [vmem:[%s550_s2 + $0x10] sm:$0xff]  ;;  %v427_v10 = vld [vmem:[%s549_s1 + $0x8] sm:$0xff]  }
   0x2   :  { %v426_v3 = vld [vmem:[%s549_s1] sm:$0xff]   ;;  %v78_v5 = vsel %vm76_vm1, %v77_v2, 0  ;;  %13 = vst [vmem:[#allocation2] sm:$0x1] %v12_v4  ;;  %424 = vset.pattern.permute.xlu0 %v433_v8  ;;  %425 = vset.pattern.permute.xlu1 %v433_v8  ;;  %v35_v11 = vld [vmem:[%s550_s2 + $0x8] sm:$0xff]  ;;  %v37_v12 = vld [vmem:[%s550_s2 + $0x18] sm:$0xff] }
   0x3   :  { %v80_v6 = vand.u32 %v78_v5, %v29_v0  ;;  %392 = vmatprep.mubr.msk.bf16.mxu0 %vm68_vm2, %v426_v3  ;;  %v34_v7 = vld [vmem:[%s550_s2] sm:$0xff]  ;;  %50 = vperm.xlu1 %425, %v36_v9   ;;  %v146_v14 = vld [vmem:[%s552_s4 + $0x8] sm:$0xff]  ;;  %v147_v15 = vld [vmem:[%s552_s4 + $0x10] sm:$0xff]  ;;  %vm213_vm3 = vcmask 261120   ;;  %v434_v44 = vmov 0.0   ;;  %vm435_vm4 = vmmov 0  }
   0x4   :  { %40 = vperm.xlu0 %424, %v34_v7   ;;  %v145_v13 = vld [vmem:[%s552_s4] sm:$0xff]  ;;  %v148_v16 = vld [vmem:[%s552_s4 + $0x18] sm:$0xff]  ;;  %v150_v18 = vld [vmem:[%s552_s4 + $0x28] sm:$0xff]  ;;  %vm314_vm5 = vcmask 523264  }
   0x5   :  { %390 = vmatprep.subr.bf16.mxu0 %v80_v6  ;;  %v149_v17 = vld [vmem:[%s552_s4 + $0x20] sm:$0xff]  ;;  %v151_v19 = vld [vmem:[%s552_s4 + $0x30] sm:$0xff]  ;;  %v152_v20 = vld [vmem:[%s552_s4 + $0x38] sm:$0xff] }
   0x6   :  { %391 = vmatpush3.bf16.msra.mxu0 %v80_v6  ;;  %v428_v22 = vld [vmem:[%s553_s3] sm:$0xff]   ;;  %v429_v41 = vld [vmem:[%s553_s3 + $0x8] sm:$0xff]   ;;  %v430_v42 = vld [vmem:[%s553_s3 + $0x10] sm:$0xff]  }
   0x7   :  { %55 = vperm.xlu1 %425, %v37_v12   ;;  %400 = vmatprep.mubr.msk.bf16.mxu1 %vm213_vm3, %v428_v22  ;;  %v431_v43 = vld [vmem:[%s553_s3 + $0x18] sm:$0xff]  }
   0x8   :  { %45 = vperm.xlu0 %424, %v35_v11   ;;  %408 = vmatprep.subr.bf16.mxu0 %v434_v44 }
   0x9   :  { %393 = vmatmul.mubr.msk.bf16.vlgmr.msra.gmra.mrb[0].mxu0 %vm68_vm2, %v427_v10  ;;  %v304_v21 = vld [vmem:[#allocation2] sm:$0x1] }
   0xa   :  { %416 = vmatprep.mubr.msk.bf16.mxu0 %vm435_vm4, %v434_v44 }
   0xb   :  { %160 = vperm.xlu1 %425, %v146_v14  }
   0xc   :  { %155 = vperm.xlu0 %424, %v145_v13  }
   0xf   :  { %170 = vperm.xlu1 %425, %v148_v16  }
  0x10   :  { %165 = vperm.xlu0 %424, %v147_v15  }
  0x13   :  { %180 = vperm.xlu1 %425, %v150_v18   ;;  %v310_v18 = vlaneseq }
  0x14   :  { %175 = vperm.xlu0 %424, %v149_v17   ;;  %v303_v17 = vld [vmem:[%s554_s5] sm:$0x1] }
  0x17   :  { %190 = vperm.xlu1 %425, %v152_v20  }
  0x18   :  { %185 = vperm.xlu0 %424, %v151_v19   ;;  %v311_v19 = vshrl.u32 %v310_v18, 7 }
  0x1a   :  { %v312_v20 = vsub.s32 0, %v311_v19 }
  0x1c   :  { %307 = vperm.xlu0 %424, %v304_v21  }
  0x82   :  { %v51_v23 = vpop.permute.xlu1 %50 }
  0x83   :  { %v41_v24 = vpop.permute.xlu0 %40 }
  0x86   :  { %v56_v28 = vpop.permute.xlu1 %55 }
  0x87   :  { %v46_v31 = vpop.permute.xlu0 %45 }
  0x8a   :  { %v161_v46 = vpop.permute.xlu1 %160 }
  0x8b   :  { %v156_v45 = vpop.permute.xlu0 %155 }
  0x8e   :  { %v171_v48 = vpop.permute.xlu1 %170 }
  0x8f   :  { %v166_v47 = vpop.permute.xlu0 %165 }
  0x92   :  { %v181_v57 = vpop.permute.xlu1 %180 }
  0x93   :  { %v176_v52 = vpop.permute.xlu0 %175 }
  0x96   :  { %v191_v5 = vpop.permute.xlu1 %190 }
  0x97   :  { %v186_v0 = vpop.permute.xlu0 %185 }
  0x9b   :  { %v308_v21 = vpop.permute.xlu0 %307 }
  0x9c   :  { %v313_v22 = vrot.slane %v308_v21, %v312_v20 }
  0xdc   :  { %v394_v25 = vpop.f32.mrb[0].mxu0 }
  0xdd   :  { %v125_v26 = vadd.f32 %v394_v25, %v51_v23  ;;  %v116_v27 = vpop.f32.mrb[1].mxu0 }
  0xde   :  { %v117_v29 = vadd.f32 %v116_v27, %v41_v24  ;;  %v395_v30 = vpop.f32.mrb[2].mxu0 }
  0xdf   :  { %v128_v32 = vadd.f32 %v395_v30, %v56_v28  ;;  %v119_v33 = vpop.f32.mrb[3].mxu0  ;;  %v133_v35 = vmax.f32 %v125_v26, 0.0 }
  0xe0   :  { %v120_v34 = vadd.f32 %v119_v33, %v46_v31  ;;  %v131_v37 = vmax.f32 %v117_v29, 0.0 }
  0xe1   :  { %v134_v36 = vmax.f32 %v128_v32, 0.0 }
  0xe2   :  { %v132_v38 = vmax.f32 %v120_v34, 0.0 }
  0xe3   :  { %v136_v39 = vpack.c.bf16 %v134_v36, %v133_v35 }
  0xe4   :  { %v135_v40 = vpack.c.bf16 %v132_v38, %v131_v37 }
  0xe6   :  { %396 = vmatprep.subr.bf16.mxu1 %v135_v40 }
  0xe7   :  { %397 = vmatpush3.bf16.msra.mxu1 %v135_v40 }
  0xe8   :  { %398 = vmatprep.subr.bf16.mxu1 %v136_v39 }
  0xeb   :  { %399 = vmatpush3.bf16.msra.mxu1 %v136_v39 }
  0xee   :  { %401 = vmatmul.mubr.msk.bf16.vlgmr.msra.gmra.mrb[0].mxu1 %vm213_vm3, %v429_v41 }
  0xef   :  { %404 = vmatprep.mubr.msk.bf16.mxu1 %vm213_vm3, %v430_v42 }
  0xf6   :  { %405 = vmatmul.mubr.msk.bf16.gmra.mrb[4].mxu1 %vm213_vm3, %v431_v43 }
 0x1c1   :  { %v402_v49 = vpop.f32.mrb[0].mxu1 }
 0x1c2   :  { %v269_v50 = vadd.f32 %v402_v49, %v166_v47  ;;  %v260_v51 = vpop.f32.mrb[1].mxu1 }
 0x1c3   :  { %v261_v53 = vadd.f32 %v260_v51, %v156_v45  ;;  %v403_v54 = vpop.f32.mrb[2].mxu1 }
 0x1c4   :  { %v272_v55 = vadd.f32 %v403_v54, %v171_v48  ;;  %v263_v56 = vpop.f32.mrb[3].mxu1  ;;  %v293_v59 = vmax.f32 %v269_v50, 0.0 }
 0x1c5   :  { %v264_v58 = vadd.f32 %v263_v56, %v161_v46  ;;  %v291_v61 = vmax.f32 %v261_v53, 0.0 }
 0x1c6   :  { %v294_v60 = vmax.f32 %v272_v55, 0.0 }
 0x1c7   :  { %v292_v62 = vmax.f32 %v264_v58, 0.0 }
 0x1c8   :  { %v300_v63 = vpack.c.bf16 %v294_v60, %v293_v59 }
 0x1c9   :  { %v299_v1 = vpack.c.bf16 %v292_v62, %v291_v61  ;;  %v406_v2 = vpop.f32.mrb[4].mxu1 }
 0x1ca   :  { %v285_v3 = vadd.f32 %v406_v2, %v186_v0  ;;  %v276_v4 = vpop.f32.mrb[5].mxu1 }
 0x1cb   :  { %v277_v6 = vadd.f32 %v276_v4, %v176_v52  ;;  %v407_v7 = vpop.f32.mrb[6].mxu1  ;;  %409 = vmatpush3.bf16.msra.mxu0 %v299_v1 }
 0x1cc   :  { %v288_v8 = vadd.f32 %v407_v7, %v191_v5  ;;  %v279_v9 = vpop.f32.mrb[7].mxu1  ;;  %410 = vmatprep.subr.bf16.mxu0 %v434_v44  ;;  %v297_v11 = vmax.f32 %v285_v3, 0.0 }
 0x1cd   :  { %v280_v10 = vadd.f32 %v279_v9, %v181_v57  ;;  %v295_v13 = vmax.f32 %v277_v6, 0.0 }
 0x1ce   :  { %v298_v12 = vmax.f32 %v288_v8, 0.0 }
 0x1cf   :  { %v296_v14 = vmax.f32 %v280_v10, 0.0  ;;  %411 = vmatpush3.bf16.msra.mxu0 %v300_v63 }
 0x1d0   :  { %v302_v15 = vpack.c.bf16 %v298_v12, %v297_v11  ;;  %412 = vmatprep.subr.bf16.mxu0 %v434_v44 }
 0x1d1   :  { %v301_v16 = vpack.c.bf16 %v296_v14, %v295_v13 }
 0x1d3   :  { %413 = vmatpush3.bf16.msra.mxu0 %v301_v16 }
 0x1d4   :  { %414 = vmatprep.subr.bf16.mxu0 %v434_v44 }
 0x1d7   :  { %415 = vmatpush3.bf16.msra.mxu0 %v302_v15 }
 0x1da   :  { %417 = vmatmul.mubr.msk.bf16.vlgmr.msra.gmra.mrb[4].mxu0 %vm314_vm5, %v303_v17 }
 0x2ad   :  { %v352_v23 = vpop.f32.mrb[4].mxu0 }
 0x2ae   :  { %v353_v24 = vadd.f32 %v352_v23, %v313_v22  ;;  %v418_v25 = vpop.f32.mrb[5].mxu0 }
 0x2af   :  { %v355_v26 = vpop.f32.mrb[6].mxu0 }
 0x2b0   :  { %358 = vst [vmem:[%s555_s7] sm:$0x1] %v353_v24  ;;  %v419_v27 = vpop.f32.mrb[7].mxu0 }

</bundles_post_ra>
